<compile_context>
chip_gen: v5e
topology: v5e:2x2
jax: 0.10.0
libtpu: 0.0.40
codegen_flags: <defaults>
</compile_context>

<pallas_src>
import jax
import jax.numpy as jnp
from jax import lax
from jax.experimental import pallas as pl
from jax.experimental.pallas import tpu as pltpu


# ------------------------------ Pallas kernel ------------------------------ #

def _bert_embedding_kernel(seq_ref,       # SMEM (B*S,) int32   scalar prefetch
                           seg_ref,       # VMEM (S, 1) int32   segment ids
                           tok_hbm_ref,   # HBM  (V, H) f32     vocab table
                           seg_tbl_ref,   # VMEM (G, H) f32     segment table
                           pos_tbl_ref,   # VMEM (S, H) f32     position table
                           out_ref,       # VMEM (S, H) f32     output block
                           tok_buf,       # VMEM (S, H) f32     gathered rows
                           copy_sems):    # DMA sems (S,)
    b = pl.program_id(0)
    S, H = out_ref.shape
    V = tok_hbm_ref.shape[0]
    G = seg_tbl_ref.shape[0]
    base = b * S

    # ---- token embedding: row gather straight from HBM (DMA, not MXU) ----
    def _issue(t, carry):
        idx = seq_ref[base + t]
        idx = jnp.minimum(jnp.maximum(idx, 0), V - 1)   # guard OOB ids
        pltpu.make_async_copy(tok_hbm_ref.at[pl.ds(idx, 1), :],
                              tok_buf.at[pl.ds(t, 1), :],
                              copy_sems.at[t]).start()
        return carry

    def _wait(t, carry):
        pltpu.make_async_copy(tok_hbm_ref.at[pl.ds(0, 1), :],   # dummy src
                              tok_buf.at[pl.ds(t, 1), :],
                              copy_sems.at[t]).wait()
        return carry

    lax.fori_loop(0, S, _issue, 0)   # launch all S row DMAs (overlap)
    lax.fori_loop(0, S, _wait, 0)    # then drain them

    # ---- segment embedding: G tiny -> VPU selects, no matmul ----
    seg_ids = seg_ref[...]                               # (S, 1) int32
    seg_e = jnp.zeros((S, H), jnp.float32)
    for g in range(G):                                   # static, G == 2
        seg_e = jnp.where(seg_ids == g, seg_tbl_ref[pl.ds(g, 1), :], seg_e)

    # ---- position embedding: indices are arange(S) -> plain broadcast add ----
    out_ref[...] = (tok_buf[...] + seg_e + pos_tbl_ref[...]).astype(out_ref.dtype)


# --------------------------------- wrapper ---------------------------------- #

@jax.jit
def bert_embedding_forward(params, seq, seg):
    tok_tbl = params['tok'].astype(jnp.float32)
    seg_tbl = params['seg'].astype(jnp.float32)
    pos_tbl = params['pos'].astype(jnp.float32)

    B, S = seq.shape
    V, H = tok_tbl.shape
    G = seg_tbl.shape[0]
    assert pos_tbl.shape[0] == S, "position table must cover sentence_size"

    seq_flat = seq.reshape(B * S).astype(jnp.int32)      # scalar-prefetch ids
    seg_col = seg.reshape(B * S, 1).astype(jnp.int32)    # select operand

    grid_spec = pltpu.PrefetchScalarGridSpec(
        num_scalar_prefetch=1,
        grid=(B,),
        in_specs=[
            pl.BlockSpec((S, 1), lambda b, seq_idx: (b, 0)),   # segment ids
            pl.BlockSpec(memory_space=pl.ANY),                 # vocab table (HBM)
            pl.BlockSpec((G, H), lambda b, seq_idx: (0, 0)),   # segment table
            pl.BlockSpec((S, H), lambda b, seq_idx: (0, 0)),   # position table
        ],
        out_specs=pl.BlockSpec((S, H), lambda b, seq_idx: (b, 0)),
        scratch_shapes=[
            pltpu.VMEM((S, H), jnp.float32),                   # gathered rows
            pltpu.SemaphoreType.DMA((S,)),                     # one sem per row
        ],
    )

    out_flat = pl.pallas_call(
        _bert_embedding_kernel,
        out_shape=jax.ShapeDtypeStruct((B * S, H), jnp.float32),
        grid_spec=grid_spec,
        compiler_params=pltpu.CompilerParams(
            dimension_semantics=("parallel",)),
    )(seq_flat, seg_col, tok_tbl, seg_tbl, pos_tbl)

    return out_flat.reshape(B, S, H)   # free reshape in HBM


# ------------------------------ pure-JAX reference -------------------------- #

def ref_forward(params, seq, seg):
    return params['tok'][seq] + params['seg'][seg] + params['pos'][None, :, :]


# ----------------------------------- main ----------------------------------- #

if __name__ == "__main__":
    segment_size = 2
    hidden_size = 32
    vocab_size = 64
    dropout = 0.1          # identity at inference
    sentence_size = 8
    batch = 6              # leading dim of seq / seg

    key = jax.random.PRNGKey(0)
    k_tok, k_pos, k_seg, k_seq, k_sid = jax.random.split(key, 5)

    params = {
        'tok': 0.1 * jax.random.normal(k_tok, (vocab_size, hidden_size),
                                       dtype=jnp.float32),
        'pos': 0.1 * jax.random.normal(k_pos, (sentence_size, hidden_size),
                                       dtype=jnp.float32),
        'seg': 0.1 * jax.random.normal(k_seg, (segment_size, hidden_size),
                                       dtype=jnp.float32),
    }
    seq = jax.random.randint(k_seq, (batch, sentence_size), 0, vocab_size,
                             dtype=jnp.int32)
    seg = jax.random.randint(k_sid, (batch, sentence_size), 0, segment_size,
                             dtype=jnp.int32)

    out = jax.block_until_ready(bert_embedding_forward(params, seq, seg))
    ref = jax.block_until_ready(ref_forward(params, seq, seg))

    assert out.shape == (batch, sentence_size, hidden_size), out.shape
    err = float(jnp.max(jnp.abs(out - ref)))
    if not (err < 1e-5):
        raise AssertionError(f"mismatch vs reference: max abs err {err}")
    print("KERNEL_OK")
</pallas_src>

<mosaic_0001>
module attributes {stable_mosaic.version = 11 : i64} {
  func.func @_bert_embedding_kernel(%arg0: i32, %arg1: memref<48xi32, #tpu.memory_space<smem>>, %arg2: memref<8x1xi32, #tpu.memory_space<vmem>>, %arg3: memref<64x32xf32, #tpu.memory_space<any>>, %arg4: memref<2x32xf32, #tpu.memory_space<vmem>>, %arg5: memref<8x32xf32, #tpu.memory_space<vmem>>, %arg6: memref<8x32xf32, #tpu.memory_space<vmem>>, %arg7: memref<8x32xf32, #tpu.memory_space<vmem>>, %arg8: memref<8x!tpu.dma_semaphore, #tpu.memory_space<semaphore_mem>>) attributes {dimension_semantics = [#tpu.dimension_semantics<parallel>], iteration_bounds = array<i64: 6>, scalar_prefetch = 1 : i64, scratch_operands = 2 : i64, tpu.core_type = #tpu.core_type<tc>, window_params = [{transform_indices = @transform_0, window_bounds = array<i64: 8, 1>}, {}, {pipeline_mode = #tpu.pipeline_mode<synchronous>, transform_indices = @transform_2, window_bounds = array<i64: 2, 32>}, {pipeline_mode = #tpu.pipeline_mode<synchronous>, transform_indices = @transform_3, window_bounds = array<i64: 8, 32>}, {transform_indices = @transform_4, window_bounds = array<i64: 8, 32>}]} {
    %c8_i32 = arith.constant 8 : i32
    %0 = arith.muli %arg0, %c8_i32 : i32
    %c0_i32 = arith.constant 0 : i32
    %c8_i32_0 = arith.constant 8 : i32
    %1 = arith.addi %c0_i32, %c8_i32_0 : i32
    %c1_i32 = arith.constant 1 : i32
    scf.for %arg9 = %c0_i32 to %1 step %c1_i32  : i32 {
      %26 = arith.addi %0, %arg9 : i32
      %27 = arith.index_cast %26 : i32 to index
      %28 = memref.load %arg1[%27] : memref<48xi32, #tpu.memory_space<smem>>
      %c0_i32_18 = arith.constant 0 : i32
      %29 = arith.maxsi %28, %c0_i32_18 : i32
      %c63_i32 = arith.constant 63 : i32
      %30 = arith.minsi %29, %c63_i32 : i32
      %c0_i32_19 = arith.constant 0 : i32
      %31 = tpu.memref_slice %arg3[%30, %c0_i32_19] : memref<64x32xf32, #tpu.memory_space<any>> -> memref<1x32xf32, #tpu.memory_space<any>>
      %c0_i32_20 = arith.constant 0 : i32
      %32 = tpu.memref_slice %arg7[%arg9, %c0_i32_20] : memref<8x32xf32, #tpu.memory_space<vmem>> -> memref<1x32xf32, #tpu.memory_space<vmem>>
      %33 = tpu.memref_slice %arg8[%arg9] : memref<8x!tpu.dma_semaphore, #tpu.memory_space<semaphore_mem>> -> memref<1x!tpu.dma_semaphore, #tpu.memory_space<semaphore_mem>>
      %34 = tpu.memref_squeeze %33 : memref<1x!tpu.dma_semaphore, #tpu.memory_space<semaphore_mem>> -> memref<!tpu.dma_semaphore, #tpu.memory_space<semaphore_mem>>
      tpu.enqueue_dma source(%31 : memref<1x32xf32, #tpu.memory_space<any>>) target(%32 : memref<1x32xf32, #tpu.memory_space<vmem>>) target_semaphore(%34 : memref<!tpu.dma_semaphore, #tpu.memory_space<semaphore_mem>>)
    }
    %c8_i32_1 = arith.constant 8 : i32
    %c0_i32_2 = arith.constant 0 : i32
    %c8_i32_3 = arith.constant 8 : i32
    %2 = arith.addi %c0_i32_2, %c8_i32_3 : i32
    %c1_i32_4 = arith.constant 1 : i32
    scf.for %arg9 = %c0_i32_2 to %2 step %c1_i32_4  : i32 {
      %c0_i32_18 = arith.constant 0 : i32
      %c0_i32_19 = arith.constant 0 : i32
      %26 = tpu.memref_slice %arg3[%c0_i32_18, %c0_i32_19] : memref<64x32xf32, #tpu.memory_space<any>> -> memref<1x32xf32, #tpu.memory_space<any>>
      %c0_i32_20 = arith.constant 0 : i32
      %27 = tpu.memref_slice %arg7[%arg9, %c0_i32_20] : memref<8x32xf32, #tpu.memory_space<vmem>> -> memref<1x32xf32, #tpu.memory_space<vmem>>
      %28 = tpu.memref_slice %arg8[%arg9] : memref<8x!tpu.dma_semaphore, #tpu.memory_space<semaphore_mem>> -> memref<1x!tpu.dma_semaphore, #tpu.memory_space<semaphore_mem>>
      %29 = tpu.memref_squeeze %28 : memref<1x!tpu.dma_semaphore, #tpu.memory_space<semaphore_mem>> -> memref<!tpu.dma_semaphore, #tpu.memory_space<semaphore_mem>>
      tpu.wait_dma2 semaphore(%29 : memref<!tpu.dma_semaphore, #tpu.memory_space<semaphore_mem>>) src(%26 : memref<1x32xf32, #tpu.memory_space<any>>) dst(%27 : memref<1x32xf32, #tpu.memory_space<vmem>>)
    }
    %c8_i32_5 = arith.constant 8 : i32
    %c0 = arith.constant 0 : index
    %c0_6 = arith.constant 0 : index
    %3 = vector.load %arg2[%c0, %c0_6] : memref<8x1xi32, #tpu.memory_space<vmem>>, vector<8x1xi32>
    %cst = arith.constant 0.000000e+00 : f32
    %4 = vector.broadcast %cst : f32 to vector<8x32xf32>
    %c0_i32_7 = arith.constant 0 : i32
    %5 = vector.broadcast %c0_i32_7 : i32 to vector<8x1xi32>
    %6 = arith.cmpi eq, %3, %5 : vector<8x1xi32>
    %c0_8 = arith.constant 0 : index
    %c0_9 = arith.constant 0 : index
    %7 = vector.load %arg4[%c0_8, %c0_9] : memref<2x32xf32, #tpu.memory_space<vmem>>, vector<1x32xf32>
    %8 = vector.shape_cast %6 : vector<8x1xi1> to vector<8x1xi1>
    %9 = vector.broadcast %8 : vector<8x1xi1> to vector<8x32xi1>
    %10 = vector.shape_cast %7 : vector<1x32xf32> to vector<1x32xf32>
    %11 = vector.broadcast %10 : vector<1x32xf32> to vector<8x32xf32>
    %12 = arith.select %9, %11, %4 : vector<8x32xi1>, vector<8x32xf32>
    %c1_i32_10 = arith.constant 1 : i32
    %13 = vector.broadcast %c1_i32_10 : i32 to vector<8x1xi32>
    %14 = arith.cmpi eq, %3, %13 : vector<8x1xi32>
    %c1 = arith.constant 1 : index
    %c0_11 = arith.constant 0 : index
    %15 = vector.load %arg4[%c1, %c0_11] : memref<2x32xf32, #tpu.memory_space<vmem>>, vector<1x32xf32>
    %16 = vector.shape_cast %14 : vector<8x1xi1> to vector<8x1xi1>
    %17 = vector.broadcast %16 : vector<8x1xi1> to vector<8x32xi1>
    %18 = vector.shape_cast %15 : vector<1x32xf32> to vector<1x32xf32>
    %19 = vector.broadcast %18 : vector<1x32xf32> to vector<8x32xf32>
    %20 = arith.select %17, %19, %12 : vector<8x32xi1>, vector<8x32xf32>
    %c0_12 = arith.constant 0 : index
    %c0_13 = arith.constant 0 : index
    %21 = vector.load %arg7[%c0_12, %c0_13] : memref<8x32xf32, #tpu.memory_space<vmem>>, vector<8x32xf32>
    %22 = arith.addf %21, %20 : vector<8x32xf32>
    %c0_14 = arith.constant 0 : index
    %c0_15 = arith.constant 0 : index
    %23 = vector.load %arg5[%c0_14, %c0_15] : memref<8x32xf32, #tpu.memory_space<vmem>>, vector<8x32xf32>
    %24 = arith.addf %22, %23 : vector<8x32xf32>
    %c0_16 = arith.constant 0 : index
    %c0_17 = arith.constant 0 : index
    %25 = vector.load %arg6[%c0_16, %c0_17] : memref<8x32xf32, #tpu.memory_space<vmem>>, vector<8x32xf32>
    tpu.vector_store %arg6[%c0_16, %c0_17], %24 {strides = array<i32>} : memref<8x32xf32, #tpu.memory_space<vmem>>, vector<8x32xf32>,
    return
  }
  func.func @transform_0(%arg0: i32, %arg1: memref<48xi32, #tpu.memory_space<smem>>) -> (i32, i32) {
    %c0_i32 = arith.constant 0 : i32
    %c0_i32_0 = arith.constant 0 : i32
    return %arg0, %c0_i32 : i32, i32
  }
  func.func @transform_2(%arg0: i32, %arg1: memref<48xi32, #tpu.memory_space<smem>>) -> (i32, i32) {
    %c0_i32 = arith.constant 0 : i32
    %c0_i32_0 = arith.constant 0 : i32
    %c0_i32_1 = arith.constant 0 : i32
    return %c0_i32, %c0_i32_0 : i32, i32
  }
  func.func @transform_3(%arg0: i32, %arg1: memref<48xi32, #tpu.memory_space<smem>>) -> (i32, i32) {
    %c0_i32 = arith.constant 0 : i32
    %c0_i32_0 = arith.constant 0 : i32
    %c0_i32_1 = arith.constant 0 : i32
    return %c0_i32, %c0_i32_0 : i32, i32
  }
  func.func @transform_4(%arg0: i32, %arg1: memref<48xi32, #tpu.memory_space<smem>>) -> (i32, i32) {
    %c0_i32 = arith.constant 0 : i32
    %c0_i32_0 = arith.constant 0 : i32
    return %arg0, %c0_i32 : i32, i32
  }
}

</mosaic_0001>

<bundles_post_ra>
// kernel: bert_embedding_forward.1
= control target key start
LH: loop header
LB: loop body
LE: loop exit
PB: predicated region body
PF: predicated region fallthrough
CT: control target
= control target key end

     0   :  { %s591_s21 = smov [#allocation5]   ;;  %s741_s0 = inlined_call_operand.vmem [shape: s32[48], index: 0, kind: input, shape index: {}]   ;;  %s742_s1 = inlined_call_operand.vmem [shape: s32[48,1], index: 1, kind: input, shape index: {}]   ;;  %s743_s2 = inlined_call_operand.vmem [shape: f32[64,32], index: 2, kind: input, shape index: {}]   ;;  %s744_s3 = inlined_call_operand.vmem [shape: f32[2,32], index: 3, kind: input, shape index: {}]   ;;  %s745_s4 = inlined_call_operand.vmem [shape: f32[8,32], index: 4, kind: input, shape index: {}]   ;;  %s746_s5 = inlined_call_operand.hbm [shape: f32[48,32], index: 5, kind: output, shape index: {}]  }
   0x1   :  { %s11_s20 = sshll.u32 %s741_s0, 4  ;;  %s12_s20 = int_to_ptr.vmem [resolvable:$true] %s11_s20 }
   0x2   :  { %14 = dma.vmem_to_smem %s12_s20, 16, %s591_s21, [#allocation4] }
   0x3   :  { %559 = dma.done.wait [#allocation4], 16 }
   0x4   :  { %560 = vsyncadd [#allocation4], 4294967280 }
   0x5   :  { %17 = sfence }
   0x6   :  { %18 = vsyncpa [#allocation7], 0 }
   0x7   :  { %20 = vsyncpa [#allocation7 + $0x1], 0  ;;  %s626_s22 = smov 0   ;;  %s628_s23 = smov 0  }
   0x8   :  { %s630_s24 = smov 0   ;;  %s632_s25 = smov 0  }
   0x9 LB: > { %s647_s0 = sadd.s32 4294967295, %s581_s25   ;;  %s409_s26 = sadd.s32 4294967294, %s581_s25   ;;  %s581_s25 = sphi %s632_s25, %s752_s25   ;;  %s577_s24 = sphi %s630_s24, %s751_s24   ;;  %s573_s23 = sphi %s628_s23, %s750_s23   ;;  %s569_s22 = sphi %s626_s22, %s749_s22  }
   0xa   : > { %s651_s27 = sadd.s32 1, %s581_s25   ;;  %s101_s28 = sadd.s32 1, %s577_s24 }
   0xb   : > { %s98_s29 = ssub.s32 %s581_s25, %s651_s27  ;;  %p111_p0 = scmp.ne.s32.totalorder %s577_s24, %s573_s23 }
   0xc   : > { %p99_p1 = scmp.eq.s32.totalorder %s98_s29, 0  ;;  %p112_p2 = scmp.eq.s32.totalorder %s647_s0, 5 }
   0xd   : > { %p117_p3 = scmp.ne.s32.totalorder %s573_s23, %s569_s22  ;;  %p118_p4 = scmp.eq.s32.totalorder %s409_s26, 5 }
   0xe   : > { %s662_s30 = scalar_select %p99_p1, %s577_s24, %s101_s28  }
   0xf   : > { %p664_p5 = por %p112_p2, %p111_p0  ;;  %p668_p6 = por %p118_p4, %p117_p3 }
  0x10   : > { %p412_p7 = scmp.ge.s32.totalorder %s581_s25, 1  ;;  %p149_p8 = scmp.lt.s32.totalorder %s581_s25, 7 }
  0x12   : > { %p150_p9 = pnand %p412_p7, %p149_p8 }
  0x13   : > { %s169_s8 = sand.u32 (!%p150_p9), 1, %s573_s23   ;;  %p172_p10 = scmp.lt.s32.totalorder (!%p150_p9), %s647_s0, 5 }
  0x14   : > { %153 = sbr.rel (%p150_p9) target bundleno = 190 (0xbe), region = 32  ;;  %s678_s9 = sshll.u32 (!%p150_p9), %s169_s8, 3 }
  0x15   : > { %s415_s10 = sshll.u32 (!%p150_p9), %s647_s0, 3  ;;  %s171_s16 = scalar_lea.vmem (!%p150_p9), [#allocation6], %s678_s9 }
  0x16   : > { %s583_s17 = smov (!%p150_p9), 0  }
  0x19   : > { %s173_s11 = scalar_select %p172_p10, %s647_s0, 5 }
  0x1b   : > { %s414_s12 = sshll.u32 %s173_s11, 3 }
  0x1c   : > { %s685_s15 = scalar_lea.vmem %s742_s1, %s414_s12 }
  0x1d LB: >> { %s183_s18 = sadd.s32 %s585_s17, %s415_s10  ;;  %s190_s28 = scalar_lea.vmem [#allocation2], %s585_s17  ;;  %s585_s17 = sphi %s583_s17, %s182_s17  }
  0x1e   : >> { %s184_s19 = sld [smem:[#allocation5 + %s183_s18]]  ;;  %s191_s29 = scalar_lea.sflag [#allocation3], %s585_s17 }
  0x24   : >> { %p185_p11 = scmp.gt.s32.totalorder %s184_s19, 0  ;;  %p416_p12 = scmp.lt.s32.totalorder %s184_s19, 63 }
  0x26   : >> { %s754_s19 = smov (!%p185_p11, %s184_s19), 0 }
  0x27   : >> { %s756_s19 = smov (!%p416_p12, %s754_s19), 63 }
  0x28   : >> { %s189_s26 = scalar_lea.vmem %s743_s2, %s756_s19 }
  0x29   : >> { %v206_v0 = vld [vmem:[%s189_s26] sm:$0x1] }
  0x2a   : >> { %207 = vst [vmem:[%s190_s28] sm:$0x1] %v206_v0 }
  0x2b   : >> { %225 = vsyncadd %s191_s29, 16  ;;  %s182_s17 = sadd.s32 1, %s585_s17  }
  0x2c   : >> { %p179_p13 = scmp.ge.s32.totalorder %s182_s17, 8  }
  0x2d   : > { %s587_s11 = smov (%p179_p13), 0  }
  0x2e   : > { %181 = sbr.rel (!%p179_p13) target bundleno = 29 (0x1d), region = 126 }
  0x33 LB: >> { %s232_s12 = scalar_lea.sflag [#allocation3], %s589_s11  ;;  %s589_s11 = sphi %s587_s11, %s231_s11  }
  0x34   : >> { %561 = dma.done.wait %s232_s12, 16 }
  0x35   : >> { %562 = vsyncadd %s232_s12, 4294967280  ;;  %s231_s11 = sadd.s32 1, %s589_s11  }
  0x36   : >> { %p228_p0 = scmp.ge.s32.totalorder %s231_s11, 8  }
  0x37   : > { %v236_v1 = vld [vmem:[%s685_s15] sm:$0xff] (%p228_p0)  ;;  %v592_v2 = vmov (%p228_p0), 0   ;;  %s272_s20 = scalar_lea.hbm (%p228_p0), %s746_s5, %s415_s10  ;;  %s274_s28 = sshll.u32 (%p228_p0), %s171_s16, 4  ;;  %vm259_vm4 = vcmask (%p228_p0), 261120   ;;  %s275_s28 = int_to_ptr.vmem [resolvable:$true] %s274_s28 }
  0x38   : > { %230 = sbr.rel (!%p228_p0) target bundleno = 51 (0x33), region = 137  ;;  %492 = vset.pattern.permute.xlu0 (%p228_p0), %v592_v2  ;;  %vm237_vm0 = vcmp.eq.s32.totalorder (%p228_p0), %v236_v1, 0  ;;  %vm246_vm1 = vcmp.eq.s32.totalorder (%p228_p0), %v236_v1, 1  ;;  %v493_v6 = vld [vmem:[%s744_s3] ss:$0 sm:$0xff] (%p228_p0)  ;;  %s276_s29 = sshll.u32 (%p228_p0), %s272_s20, 4  ;;  %s277_s29 = int_to_ptr.hbm [resolvable:$true] %s276_s29 }
  0x39   : > { %v239_v3 = vsel (%p228_p0), %vm237_vm0, 1, %v592_v2  ;;  %v248_v4 = vsel (%p228_p0), %vm246_vm1, 1, %v592_v2  ;;  %v494_v7 = vld [vmem:[%s744_s3 + $0x1] ss:$0 sm:$0xff] (%p228_p0)  ;;  %s262_s0 = scalar_lea.sflag (%p228_p0), [#allocation7], %s169_s8  ;;  %s521_s10 = sshra.s32 (%p228_p0), %s277_s29, 4  ;;  %s522_s10 = int_to_ptr.hbm [resolvable:$true] %s521_s10 }
  0x3a   : > { %241 = vperm.xlu0 (%p228_p0), %492, %v239_v3   ;;  %v255_v8 = vld [vmem:[#allocation2] sm:$0xff] (%p228_p0)  ;;  %s523_s11 = scalar_lea.hbm (%p228_p0), %s522_s10, 8  ;;  %s527_s14 = scalar_lea.hbm (%p228_p0), %s746_s5, 48 }
  0x3b   : > { %v257_v11 = vld [vmem:[%s745_s4] sm:$0xff] (%p228_p0)  ;;  %p524_p1 = scmp.ne.s32.totalorder (%p228_p0), %s522_s10, %s523_s11  ;;  %p528_p4 = scmp.lt.s32.totalorder (%p228_p0), %s522_s10, %s746_s5 }
  0x3c   : > { %p529_p7 = scmp.lt.s32.totalorder (%p228_p0), %s527_s14, %s523_s11 }
  0x3d   : > { %p525_p2 = pnand %p524_p1, %p664_p5 }
  0x3e   : > { %p530_p8 = por %p529_p7, %p528_p4 }
  0x3f   : > { %p526_p3 = pneg %p525_p2 }
  0x41   : > { %p531_p9 = pnand %p530_p8, %p526_p3 }
  0x42   : > { %250 = vperm.xlu0 %492, %v248_v4  }
  0xac   : > { %v242_v5 = vpop.permute.xlu0 %241 }
  0xad   : > { %vm243_vm2 = vcmp.eq.s32.totalorder %v242_v5, 1 }
  0xae   : > { %v245_v10 = vsel %vm243_vm2, %v493_v6, 0.0 }
  0xb4   : > { %v251_v9 = vpop.permute.xlu0 %250 }
  0xb5   : > { %vm252_vm3 = vcmp.eq.s32.totalorder %v251_v9, 1 }
  0xb6   : > { %v254_v12 = vsel %vm252_vm3, %v494_v7, %v245_v10 }
  0xb7   : > { %v256_v13 = vadd.f32 %v255_v8, %v254_v12 }
  0xb9   : > { %v258_v14 = vadd.f32 %v257_v11, %v256_v13 }
  0xbb   : > { %260 = vst.msk [vmem:[%s171_s16] sm:$0xff] %vm259_vm4, %v258_v14 }
  0xbc   : > { %534 = shalt.err (!%p531_p9)
}
  0xbd   : > { %435 = dma.vmem_to_hbm [thread:$0]  (%p664_p5), %s275_s28, 128, %s277_s29, %s262_s0  }
  0xbe PF: > { %p441_p10 = scmp.ge.s32.totalorder %s581_s25, 2  ;;  %s288_s8 = sand.u32 1, %s569_s22  }
  0xbf   : > { %s289_s9 = scalar_lea.sflag [#allocation7], %s288_s8 }
  0xc0   : > { %p438_p11 = pnand %p441_p10, %p668_p6 }
  0xc2   : > { %p439_p12 = pneg %p438_p11 }
  0xc4   : > { %564 = dma.done.wait (%p439_p12), %s289_s9, 128  }
  0xc5   : > { %566 = vsyncadd (%p439_p12), %s289_s9, 4294967168  ;;  %p23_p13 = scmp.ge.s32.totalorder %s651_s27, 8   ;;  %s749_s22 = smov %s573_s23 }
  0xc6   : > { %s750_s23 = smov %s577_s24  ;;  %s751_s24 = smov %s662_s30 }
  0xc7   : > { %s752_s25 = smov %s651_s27  ;;  %25 = sbr.rel (!%p23_p13) target bundleno = 9 (0x9), region = 148 }
  0xcc   :  { %295 = vsyncpa [#allocation7], 1 }
  0xcd   :  { %297 = vsyncpa [#allocation7 + $0x1], 1 }
  0xce   :  { %298 = vsyncmov [#allocation3] }
  0xd1   :  { %s299_s25 = vpop.sfrf %298 }
  0xd2   :  { %p425_p5 = scmp.ne.s32.totalorder %s299_s25, 0 }
  0xd4   :  { %303 = shalt.err (%p425_p5)  }
  0xd5   :  { %305 = vsyncmov [#allocation3 + $0x1] }
  0xd8   :  { %s306_s6 = vpop.sfrf %305 }
  0xd9   :  { %p426_p6 = scmp.ne.s32.totalorder %s306_s6, 0 }
  0xdb   :  { %310 = shalt.err (%p426_p6)  }
  0xdc   :  { %312 = vsyncmov [#allocation3 + $0x2] }
  0xdf   :  { %s313_s7 = vpop.sfrf %312 }
  0xe0   :  { %p427_p0 = scmp.ne.s32.totalorder %s313_s7, 0 }
  0xe2   :  { %317 = shalt.err (%p427_p0)  }
  0xe3   :  { %319 = vsyncmov [#allocation3 + $0x3] }
  0xe6   :  { %s320_s16 = vpop.sfrf %319 }
  0xe7   :  { %p428_p1 = scmp.ne.s32.totalorder %s320_s16, 0 }
  0xe9   :  { %324 = shalt.err (%p428_p1)  }
  0xea   :  { %326 = vsyncmov [#allocation3 + $0x4] }
  0xed   :  { %s327_s27 = vpop.sfrf %326 }
  0xee   :  { %p429_p2 = scmp.ne.s32.totalorder %s327_s27, 0 }
  0xf0   :  { %331 = shalt.err (%p429_p2)  }
  0xf1   :  { %333 = vsyncmov [#allocation3 + $0x5] }
  0xf4   :  { %s334_s1 = vpop.sfrf %333 }
  0xf5   :  { %p430_p3 = scmp.ne.s32.totalorder %s334_s1, 0 }
  0xf7   :  { %338 = shalt.err (%p430_p3)  }
  0xf8   :  { %340 = vsyncmov [#allocation3 + $0x6] }
  0xfb   :  { %s341_s2 = vpop.sfrf %340 }
  0xfc   :  { %p431_p4 = scmp.ne.s32.totalorder %s341_s2, 0 }
  0xfe   :  { %345 = shalt.err (%p431_p4)  }
  0xff   :  { %347 = vsyncmov [#allocation3 + $0x7] }
 0x102   :  { %s348_s3 = vpop.sfrf %347 }
 0x103   :  { %p432_p7 = scmp.ne.s32.totalorder %s348_s3, 0 }
 0x105   :  { %352 = shalt.err (%p432_p7)  }

</bundles_post_ra>
